<compile_context>
chip_gen: v7x
topology: tpu7x:2x2x1
jax: 0.10.0
libtpu: 0.0.40
codegen_flags: <defaults>
</compile_context>

<pallas_src>
import jax
import jax.numpy as jnp
from jax.experimental import pallas as pl
from jax.experimental.pallas import tpu as pltpu


def mlp_kernel(xt_ref, w1_ref, b1_ref, w2_ref, b2_ref, o_ref):
    # Layer 1 on the MXU (bf16 operands, f32 accumulate):
    #   (h, d) @ (d, tb) -> (h, tb).  No transposes anywhere in the kernel.
    h1 = jnp.dot(w1_ref[...], xt_ref[...], preferred_element_type=jnp.float32)
    h1 = jnp.maximum(h1 + b1_ref[...], 0.0)          # f32 bias + ReLU on the VPU

    # Layer 2: (1, h) @ (h, tb) -> (1, tb).  Kept in f32: its MXU FLOPs are
    # negligible (out_features == 1) and the result row is already lane-dense.
    out = jnp.dot(w2_ref[...], h1, preferred_element_type=jnp.float32)
    out = jnp.maximum(out + b2_ref[0], 0.0)          # b2 is a scalar in SMEM
    o_ref[...] = out.astype(o_ref.dtype)


def _round_up(x, m):
    return (x + m - 1) // m * m


def _default_batch_tile(B):
    # Lane-axis tile: always a multiple of 128 (keeps unmasked vst on all
    # generations).  Target >= 8 grid steps (>= 4 per TensorCore on v7x) while
    # keeping tb in [256, 512]; small batches use one 128-aligned padded tile.
    if B <= 256:
        return _round_up(max(B, 128), 128)
    tb = _round_up(pl.cdiv(B, 8), 128)
    return int(min(max(tb, 256), 512))


def _vmem_limit_bytes(need_bytes):
    # Per-generation cap: physical VMEM minus ~16 MiB headroom for compiler
    # internal scratch (v5e/v6e: ~112 MiB usable, v7x: ~48 MiB usable).
    try:
        capacity = int(pltpu.get_tpu_info().vmem_capacity_bytes)
    except Exception:
        capacity = 64 << 20                       # conservative fallback
    usable = max(capacity - (16 << 20), capacity // 2)
    return int(min(max(2 * need_bytes, 32 << 20), usable))


def _build_mlp_call(d, h, tb, B_pad, out_dtype, vmem_limit, cost,
                    *, single_buffer_weights):
    # Resident operands (constant index_map) don't need double buffering.
    resident = (dict(pipeline_mode=pl.Buffered(1))
                if single_buffer_weights else {})
    in_specs = [
        # x^T tile streams along the batch (lane) axis.
        # TODO(synk): sweep pipeline_mode=pl.Buffered(3) here if the bundle
        # shows exposed x DMA waits at small d, h.
        pl.BlockSpec((d, tb), lambda i: (0, i)),
        pl.BlockSpec((h, d), lambda i: (0, 0), **resident),    # w1 (bf16, resident)
        pl.BlockSpec((h, 1), lambda i: (0, 0), **resident),    # b1 (f32, resident)
        pl.BlockSpec((1, h), lambda i: (0, 0), **resident),    # w2 (f32, resident)
        pl.BlockSpec(memory_space=pltpu.MemorySpace.SMEM),      # b2 scalar
    ]
    return pl.pallas_call(
        mlp_kernel,
        out_shape=jax.ShapeDtypeStruct((1, B_pad), out_dtype),
        grid_spec=pltpu.PrefetchScalarGridSpec(
            num_scalar_prefetch=0,
            grid=(B_pad // tb,),
            in_specs=in_specs,
            out_specs=pl.BlockSpec((1, tb), lambda i: (0, i)),  # lane-dense row
        ),
        compiler_params=pltpu.CompilerParams(
            dimension_semantics=("parallel",),
            vmem_limit_bytes=vmem_limit,
        ),
        cost_estimate=cost,
    )


def mlp_forward(x, w1, b1, w2, b2, *, tb=None):
    """x: (B, d); w1: (h, d); b1: (h,); w2: (1, h); b2: (1,)  (PyTorch nn.Linear layout)."""
    B, d = x.shape
    h = w1.shape[0]
    out_dtype = x.dtype

    tb = _default_batch_tile(B) if tb is None else _round_up(int(tb), 128)
    B_pad = _round_up(B, tb)

    # Pad ragged batches to a 128-aligned tile multiple; sliced off afterwards.
    if B_pad != B:
        x = jnp.pad(x, ((0, B_pad - B), (0, 0)))

    # bf16 for the MXU-native path (halves x/w1 HBM traffic and VMEM
    # residency); bias-add / ReLU / accumulation stay f32 inside the kernel.
    xt = x.astype(jnp.bfloat16).T                  # (d, B_pad), transposed ONCE here
    w1b = w1.astype(jnp.bfloat16)                  # (h, d) -- used untransposed now
    b1c = b1.astype(jnp.float32).reshape(h, 1)     # per-row bias for the (h, tb) tile
    w2f = w2.astype(jnp.float32)                   # (1, h), tiny -> keep f32
    b2r = b2.astype(jnp.float32).reshape(1)        # scalar -> SMEM

    # VMEM budget: double-buffered x tile + output row, resident weights/bias,
    # plus the (h, tb) f32 intermediate; 2x headroom, capped per generation.
    need = (2 * tb * d * 2 + 2 * tb * 4
            + (h * d * 2 + h * 4 + h * 4)
            + tb * h * 4)
    vmem_limit = _vmem_limit_bytes(need)

    cost = pl.CostEstimate(
        flops=2 * B_pad * d * h + 2 * B_pad * h,
        transcendentals=0,
        bytes_accessed=(B_pad * d * 2 + h * d * 2 + h * 4 + h * 4 + 4
                        + B_pad * 4),
    )

    args = (xt, w1b, b1c, w2f, b2r)
    try:
        out2d = _build_mlp_call(d, h, tb, B_pad, out_dtype, vmem_limit, cost,
                                single_buffer_weights=True)(*args)
        jax.block_until_ready(out2d)
    except Exception:
        # JAX versions without BlockSpec.pipeline_mode / pl.Buffered(1):
        # fall back to default double-buffered resident operands.
        out2d = _build_mlp_call(d, h, tb, B_pad, out_dtype, vmem_limit, cost,
                                single_buffer_weights=False)(*args)

    # TODO(synk): for production d*h where bf16 w1 exceeds ~1/3 of usable VMEM
    # (v7x), add a trailing "arbitrary" K-tiled d axis with an f32 accumulator.

    # (1, B_pad) lane-dense row -> (B, 1) column expected by the PyTorch module.
    return out2d.reshape(-1, 1)[:B]


def mlp_reference(x, w1, b1, w2, b2):
    h1 = jnp.maximum(x @ w1.T + b1, 0.0)
    return jnp.maximum(h1 @ w2.T + b2, 0.0)


if __name__ == "__main__":
    key = jax.random.PRNGKey(0)
    # Ragged batch exercises the 128-aligned padding path; 2 grid steps of 256.
    B, d, h = 500, 32, 64

    kx, k1, kb1, k2, kb2 = jax.random.split(key, 5)
    x = jax.random.normal(kx, (B, d), dtype=jnp.float32)

    # PyTorch nn.Linear parameter shapes: weight (out, in), bias (out,)
    w1 = jax.random.normal(k1, (h, d), dtype=jnp.float32) * 0.1
    b1 = jax.random.normal(kb1, (h,), dtype=jnp.float32) * 0.1
    w2 = jax.random.normal(k2, (1, h), dtype=jnp.float32) * 0.1
    b2 = jax.random.normal(kb2, (1,), dtype=jnp.float32) * 0.1

    out = jax.block_until_ready(mlp_forward(x, w1, b1, w2, b2))
    ref = mlp_reference(x, w1, b1, w2, b2)

    assert out.shape == (B, 1), out.shape
    # bf16 MXU inputs -> tolerance loosened vs. the f32 reference.
    err = float(jnp.max(jnp.abs(out - ref)))
    assert jnp.allclose(out, ref, atol=3e-2, rtol=3e-2), f"mismatch, max abs err {err}"

    print("KERNEL_OK")
</pallas_src>

<mosaic_0001>
module attributes {stable_mosaic.version = 11 : i64} {
  func.func @mlp_kernel(%arg0: i32, %arg1: memref<32x256xbf16, #tpu.memory_space<vmem>>, %arg2: memref<64x32xbf16, #tpu.memory_space<vmem>>, %arg3: memref<64x1xf32, #tpu.memory_space<vmem>>, %arg4: memref<1x64xf32, #tpu.memory_space<vmem>>, %arg5: memref<1xf32, #tpu.memory_space<smem>>, %arg6: memref<1x256xf32, #tpu.memory_space<vmem>>) attributes {dimension_semantics = [#tpu.dimension_semantics<parallel>], iteration_bounds = array<i64: 2>, scalar_prefetch = 0 : i64, scratch_operands = 0 : i64, tpu.core_type = #tpu.core_type<tc>, window_params = [{transform_indices = @transform_0, window_bounds = array<i64: 32, 256>}, {pipeline_mode = #tpu.pipeline_mode<synchronous>, transform_indices = @transform_1, window_bounds = array<i64: 64, 32>}, {pipeline_mode = #tpu.pipeline_mode<synchronous>, transform_indices = @transform_2, window_bounds = array<i64: 64, 1>}, {pipeline_mode = #tpu.pipeline_mode<synchronous>, transform_indices = @transform_3, window_bounds = array<i64: 1, 64>}, {transform_indices = @transform_4, window_bounds = array<i64: 1>}, {transform_indices = @transform_5, window_bounds = array<i64: 1, 256>}]} {
    %c0 = arith.constant 0 : index
    %c0_0 = arith.constant 0 : index
    %0 = vector.load %arg2[%c0, %c0_0] : memref<64x32xbf16, #tpu.memory_space<vmem>>, vector<64x32xbf16>
    %c0_1 = arith.constant 0 : index
    %c0_2 = arith.constant 0 : index
    %1 = vector.load %arg1[%c0_1, %c0_2] : memref<32x256xbf16, #tpu.memory_space<vmem>>, vector<32x256xbf16>
    %cst = arith.constant dense<0.000000e+00> : vector<64x256xf32>
    %2 = tpu.matmul %0, %1, %cst {dimension_numbers = #tpu.dot_dimension_numbers<[1], [0], [0], [1], [0, 0, 1, 1], [], []>} : vector<64x32xbf16>, vector<32x256xbf16>, vector<64x256xf32> -> vector<64x256xf32>
    %c0_3 = arith.constant 0 : index
    %c0_4 = arith.constant 0 : index
    %3 = vector.load %arg3[%c0_3, %c0_4] : memref<64x1xf32, #tpu.memory_space<vmem>>, vector<64x1xf32>
    %4 = vector.broadcast %3 : vector<64x1xf32> to vector<64x256xf32>
    %5 = arith.addf %2, %4 : vector<64x256xf32>
    %cst_5 = arith.constant 0.000000e+00 : f32
    %6 = vector.broadcast %cst_5 : f32 to vector<64x256xf32>
    %7 = arith.maximumf %5, %6 : vector<64x256xf32>
    %c0_6 = arith.constant 0 : index
    %c0_7 = arith.constant 0 : index
    %8 = vector.load %arg4[%c0_6, %c0_7] : memref<1x64xf32, #tpu.memory_space<vmem>>, vector<1x64xf32>
    %cst_8 = arith.constant dense<0.000000e+00> : vector<1x256xf32>
    %9 = tpu.matmul %8, %7, %cst_8 {dimension_numbers = #tpu.dot_dimension_numbers<[1], [0], [0], [1], [0, 0, 1, 1], [], []>} : vector<1x64xf32>, vector<64x256xf32>, vector<1x256xf32> -> vector<1x256xf32>
    %c0_9 = arith.constant 0 : index
    %10 = memref.load %arg5[%c0_9] : memref<1xf32, #tpu.memory_space<smem>>
    %11 = vector.broadcast %10 : f32 to vector<1x256xf32>
    %12 = arith.addf %9, %11 : vector<1x256xf32>
    %cst_10 = arith.constant 0.000000e+00 : f32
    %13 = vector.broadcast %cst_10 : f32 to vector<1x256xf32>
    %14 = arith.maximumf %12, %13 : vector<1x256xf32>
    %c0_11 = arith.constant 0 : index
    %c0_12 = arith.constant 0 : index
    %15 = vector.load %arg6[%c0_11, %c0_12] : memref<1x256xf32, #tpu.memory_space<vmem>>, vector<1x256xf32>
    tpu.vector_store %arg6[%c0_11, %c0_12], %14 {strides = array<i32>} : memref<1x256xf32, #tpu.memory_space<vmem>>, vector<1x256xf32>,
    return
  }
  func.func @transform_0(%arg0: i32) -> (i32, i32) {
    %c0_i32 = arith.constant 0 : i32
    %c0_i32_0 = arith.constant 0 : i32
    return %c0_i32, %arg0 : i32, i32
  }
  func.func @transform_1(%arg0: i32) -> (i32, i32) {
    %c0_i32 = arith.constant 0 : i32
    %c0_i32_0 = arith.constant 0 : i32
    %c0_i32_1 = arith.constant 0 : i32
    return %c0_i32, %c0_i32_0 : i32, i32
  }
  func.func @transform_2(%arg0: i32) -> (i32, i32) {
    %c0_i32 = arith.constant 0 : i32
    %c0_i32_0 = arith.constant 0 : i32
    %c0_i32_1 = arith.constant 0 : i32
    return %c0_i32, %c0_i32_0 : i32, i32
  }
  func.func @transform_3(%arg0: i32) -> (i32, i32) {
    %c0_i32 = arith.constant 0 : i32
    %c0_i32_0 = arith.constant 0 : i32
    %c0_i32_1 = arith.constant 0 : i32
    return %c0_i32, %c0_i32_0 : i32, i32
  }
  func.func @transform_4(%arg0: i32) -> i32 {
    %c0_i32 = arith.constant 0 : i32
    %c0_i32_0 = arith.constant 0 : i32
    return %c0_i32 : i32
  }
  func.func @transform_5(%arg0: i32) -> (i32, i32) {
    %c0_i32 = arith.constant 0 : i32
    %c0_i32_0 = arith.constant 0 : i32
    return %c0_i32, %arg0 : i32, i32
  }
}

module attributes {stable_mosaic.version = 11 : i64} {
  func.func @mlp_kernel(%arg0: i32, %arg1: memref<32x256xbf16, #tpu.memory_space<vmem>>, %arg2: memref<64x32xbf16, #tpu.memory_space<vmem>>, %arg3: memref<64x1xf32, #tpu.memory_space<vmem>>, %arg4: memref<1x64xf32, #tpu.memory_space<vmem>>, %arg5: memref<1xf32, #tpu.memory_space<smem>>, %arg6: memref<1x256xf32, #tpu.memory_space<vmem>>) attributes {dimension_semantics = [#tpu.dimension_semantics<parallel>], iteration_bounds = array<i64: 2>, scalar_prefetch = 0 : i64, scratch_operands = 0 : i64, tpu.core_type = #tpu.core_type<tc>, window_params = [{transform_indices = @transform_0, window_bounds = array<i64: 32, 256>}, {pipeline_mode = #tpu.pipeline_mode<synchronous>, transform_indices = @transform_1, window_bounds = array<i64: 64, 32>}, {pipeline_mode = #tpu.pipeline_mode<synchronous>, transform_indices = @transform_2, window_bounds = array<i64: 64, 1>}, {pipeline_mode = #tpu.pipeline_mode<synchronous>, transform_indices = @transform_3, window_bounds = array<i64: 1, 64>}, {transform_indices = @transform_4, window_bounds = array<i64: 1>}, {transform_indices = @transform_5, window_bounds = array<i64: 1, 256>}]} {
    %c0 = arith.constant 0 : index
    %c0_0 = arith.constant 0 : index
    %0 = vector.load %arg2[%c0, %c0_0] : memref<64x32xbf16, #tpu.memory_space<vmem>>, vector<64x32xbf16>
    %c0_1 = arith.constant 0 : index
    %c0_2 = arith.constant 0 : index
    %1 = vector.load %arg1[%c0_1, %c0_2] : memref<32x256xbf16, #tpu.memory_space<vmem>>, vector<32x256xbf16>
    %cst = arith.constant dense<0.000000e+00> : vector<64x256xf32>
    %2 = tpu.matmul %0, %1, %cst {dimension_numbers = #tpu.dot_dimension_numbers<[1], [0], [0], [1], [0, 0, 1, 1], [], []>} : vector<64x32xbf16>, vector<32x256xbf16>, vector<64x256xf32> -> vector<64x256xf32>
    %c0_3 = arith.constant 0 : index
    %c0_4 = arith.constant 0 : index
    %3 = vector.load %arg3[%c0_3, %c0_4] : memref<64x1xf32, #tpu.memory_space<vmem>>, vector<64x1xf32>
    %4 = vector.broadcast %3 : vector<64x1xf32> to vector<64x256xf32>
    %5 = arith.addf %2, %4 : vector<64x256xf32>
    %cst_5 = arith.constant 0.000000e+00 : f32
    %6 = vector.broadcast %cst_5 : f32 to vector<64x256xf32>
    %7 = arith.maximumf %5, %6 : vector<64x256xf32>
    %c0_6 = arith.constant 0 : index
    %c0_7 = arith.constant 0 : index
    %8 = vector.load %arg4[%c0_6, %c0_7] : memref<1x64xf32, #tpu.memory_space<vmem>>, vector<1x64xf32>
    %cst_8 = arith.constant dense<0.000000e+00> : vector<1x256xf32>
    %9 = tpu.matmul %8, %7, %cst_8 {dimension_numbers = #tpu.dot_dimension_numbers<[1], [0], [0], [1], [0, 0, 1, 1], [], []>} : vector<1x64xf32>, vector<64x256xf32>, vector<1x256xf32> -> vector<1x256xf32>
    %c0_9 = arith.constant 0 : index
    %10 = memref.load %arg5[%c0_9] : memref<1xf32, #tpu.memory_space<smem>>
    %11 = vector.broadcast %10 : f32 to vector<1x256xf32>
    %12 = arith.addf %9, %11 : vector<1x256xf32>
    %cst_10 = arith.constant 0.000000e+00 : f32
    %13 = vector.broadcast %cst_10 : f32 to vector<1x256xf32>
    %14 = arith.maximumf %12, %13 : vector<1x256xf32>
    %c0_11 = arith.constant 0 : index
    %c0_12 = arith.constant 0 : index
    %15 = vector.load %arg6[%c0_11, %c0_12] : memref<1x256xf32, #tpu.memory_space<vmem>>, vector<1x256xf32>
    tpu.vector_store %arg6[%c0_11, %c0_12], %14 {strides = array<i32>} : memref<1x256xf32, #tpu.memory_space<vmem>>, vector<1x256xf32>,
    return
  }
  func.func @transform_0(%arg0: i32) -> (i32, i32) {
    %c0_i32 = arith.constant 0 : i32
    %c0_i32_0 = arith.constant 0 : i32
    return %c0_i32, %arg0 : i32, i32
  }
  func.func @transform_1(%arg0: i32) -> (i32, i32) {
    %c0_i32 = arith.constant 0 : i32
    %c0_i32_0 = arith.constant 0 : i32
    %c0_i32_1 = arith.constant 0 : i32
    return %c0_i32, %c0_i32_0 : i32, i32
  }
  func.func @transform_2(%arg0: i32) -> (i32, i32) {
    %c0_i32 = arith.constant 0 : i32
    %c0_i32_0 = arith.constant 0 : i32
    %c0_i32_1 = arith.constant 0 : i32
    return %c0_i32, %c0_i32_0 : i32, i32
  }
  func.func @transform_3(%arg0: i32) -> (i32, i32) {
    %c0_i32 = arith.constant 0 : i32
    %c0_i32_0 = arith.constant 0 : i32
    %c0_i32_1 = arith.constant 0 : i32
    return %c0_i32, %c0_i32_0 : i32, i32
  }
  func.func @transform_4(%arg0: i32) -> i32 {
    %c0_i32 = arith.constant 0 : i32
    %c0_i32_0 = arith.constant 0 : i32
    return %c0_i32 : i32
  }
  func.func @transform_5(%arg0: i32) -> (i32, i32) {
    %c0_i32 = arith.constant 0 : i32
    %c0_i32_0 = arith.constant 0 : i32
    return %c0_i32, %arg0 : i32, i32
  }
}

</mosaic_0001>

<bundles_post_ra>
// kernel: tpu_custom_call.1
= control target key start
LH: loop header
LB: loop body
LE: loop exit
PB: predicated region body
PF: predicated region fallthrough
CT: control target
= control target key end

     0   :  { %s1016_s0 = inlined_call_operand.vmem [shape: bf16[32,512], index: 0, kind: input, shape index: {}]   ;;  %s1017_s1 = inlined_call_operand.vmem [shape: bf16[64,32], index: 1, kind: input, shape index: {}]   ;;  %s1018_s2 = inlined_call_operand.vmem [shape: f32[64,1], index: 2, kind: input, shape index: {}]   ;;  %s1019_s3 = inlined_call_operand.vmem [shape: f32[1,64], index: 3, kind: input, shape index: {}]   ;;  %s1020_s4 = inlined_call_operand.<no memory space> [shape: f32[1], index: 4, kind: input, shape index: {}]   ;;  %s1021_s5 = inlined_call_operand.hbm [shape: f32[1,512], index: 5, kind: output, shape index: {}]  }
   0x1   :  { %10 = sst [smem:[#allocation2]] %s1020_s4 }
   0x2   :  { %11 = vsyncpa [#allocation5], 0 }
   0x3   :  { %13 = vsyncpa [#allocation5 + $0x1], 0  ;;  %s863_s20 = smov 0   ;;  %s865_s21 = smov 0  }
   0x4   :  { %s867_s22 = smov 0   ;;  %s869_s23 = smov 0  }
   0x5 LB: > { %s658_s4 = sadd.s32 4294967295, %s824_s23   ;;  %s659_s24 = sadd.s32 4294967294, %s824_s23   ;;  %s824_s23 = sphi %s869_s23, %s1027_s23   ;;  %s820_s22 = sphi %s867_s22, %s1026_s22   ;;  %s816_s21 = sphi %s865_s21, %s1025_s21   ;;  %s812_s20 = sphi %s863_s20, %s1024_s20  }
   0x6   : > { %s886_s25 = sadd.s32 1, %s824_s23   ;;  %s26_s26 = sadd.s32 1, %s820_s22 }
   0x7   : > { %s23_s27 = ssub.s32 %s824_s23, %s886_s25  ;;  %p33_p0 = scmp.ne.s32.totalorder %s820_s22, %s816_s21 }
   0x8   : > { %p24_p1 = scmp.eq.s32.totalorder %s23_s27, 0  ;;  %p34_p2 = scmp.eq.s32.totalorder %s824_s23, 0 }
   0x9   : > { %p147_p3 = scmp.eq.s32.totalorder %s658_s4, 1  ;;  %p152_p4 = scmp.ne.s32.totalorder %s816_s21, %s812_s20 }
   0xa   : > { %s899_s28 = scalar_select %p24_p1, %s820_s22, %s26_s26  }
   0xb   : > { %p35_p5 = por %p34_p2, %p33_p0  ;;  %p901_p6 = por %p147_p3, %p33_p0 }
   0xc   : > { %p153_p7 = scmp.eq.s32.totalorder %s659_s24, 1  ;;  %p661_p9 = scmp.ge.s32.totalorder %s824_s23, 2 }
   0xe   : > { %p905_p8 = por %p153_p7, %p152_p4  ;;  %181 = sbr.rel (%p661_p9) target bundleno = 28 (0x1c), region = 32 }
  0x15   : > { %184 = sbr.rel (!%p35_p5) target bundleno = 28 (0x1c), region = 36  ;;  %s186_s6 = sand.u32 (%p35_p5), 1, %s820_s22  }
  0x16   : > { %s686_s7 = sshll.u32 (%p35_p5), %s824_s23, 3  ;;  %s662_s8 = sshll.u32 (%p35_p5), %s186_s6, 5 }
  0x17   : > { %s191_s11 = scalar_lea.vmem (%p35_p5), %s1016_s0, %s686_s7  ;;  %s188_s12 = scalar_lea.vmem (%p35_p5), [#allocation3], %s662_s8 }
  0x18   : > { %v225_v0 = vld [vmem:[%s191_s11] sm:$0xff] (%p35_p5)  ;;  %v227_v1 = vld [vmem:[%s191_s11 + $0x10] sm:$0xff] (%p35_p5) }
  0x19   : > { %v229_v2 = vld [vmem:[%s191_s11 + $0x20] sm:$0xff] (%p35_p5)  ;;  %226 = vst [vmem:[%s188_s12] sm:$0xff] (%p35_p5), %v225_v0  ;;  %228 = vst [vmem:[%s188_s12 + $0x8] sm:$0xff] (%p35_p5), %v227_v1  ;;  %v231_v3 = vld [vmem:[%s191_s11 + $0x30] sm:$0xff] (%p35_p5) }
  0x1a   : > { %230 = vst [vmem:[%s188_s12 + $0x10] sm:$0xff] (%p35_p5), %v229_v2  ;;  %232 = vst [vmem:[%s188_s12 + $0x18] sm:$0xff] (%p35_p5), %v231_v3 }
  0x1c PF: > { %p665_p10 = scmp.ge.s32.totalorder %s824_s23, 1  ;;  %p237_p11 = scmp.lt.s32.totalorder %s824_s23, 3 }
  0x1e   : > { %p238_p12 = pnand %p665_p10, %p237_p11 }
  0x1f   : > { %s920_s13 = sand.u32 (!%p238_p12), 1, %s816_s21   ;;  %v826_v4 = vmov (!%p238_p12), 0   ;;  %v286_v9 = vld [vmem:[%s1018_s2] sm:$0xff] (!%p238_p12)  ;;  %v288_v10 = vld [vmem:[%s1018_s2 + $0x10] sm:$0xff] (!%p238_p12)  ;;  %v287_v13 = vld [vmem:[%s1018_s2 + $0x8] sm:$0xff] (!%p238_p12)  ;;  %vm374_vm0 = vcmask (!%p238_p12), 261120  }
  0x20   : > { %241 = sbr.rel (%p238_p12) target bundleno = 521 (0x209), region = 74  ;;  %s666_s14 = sshll.u32 (!%p238_p12), %s920_s13, 5  ;;  %419 = vmatprep.mubr.bf16.mxu0 (!%p238_p12), %v826_v4  ;;  %439 = vmatprep.mubr.bf16.mxu1 (!%p238_p12), %v826_v4  ;;  %v758_v11 = vld [vmem:[%s1017_s1] sm:$0xff] (!%p238_p12)   ;;  %v759_v12 = vld [vmem:[%s1017_s1 + $0x10] sm:$0xff] (!%p238_p12)   ;;  %v289_v14 = vld [vmem:[%s1018_s2 + $0x18] sm:$0xff] (!%p238_p12)  ;;  %v827_v21 = vmov (!%p238_p12), 0.0  }
  0x21   : > { %750 = vset.pattern.permute.xlu0 (!%p238_p12), %v826_v4  ;;  %751 = vset.pattern.permute.xlu1 (!%p238_p12), %v826_v4  ;;  %s246_s15 = scalar_lea.vmem (!%p238_p12), [#allocation3], %s666_s14  ;;  %v290_v15 = vld [vmem:[%s1018_s2 + $0x20] sm:$0xff] (!%p238_p12)  ;;  %v291_v16 = vld [vmem:[%s1018_s2 + $0x28] sm:$0xff] (!%p238_p12)  ;;  %v761_v18 = vld [vmem:[%s1017_s1 + $0x18] sm:$0xff] (!%p238_p12)   ;;  %vm479_vm1 = vcmask (!%p238_p12), 523264   ;;  %s477_s9 = sld [smem:[#allocation2]] (!%p238_p12) }
  0x22   : > { %v752_v5 = vld [vmem:[%s246_s15 + $0x4] ss:$8 sps:$4 sm:$0xff] (!%p238_p12)   ;;  %v754_v6 = vld [vmem:[%s246_s15] ss:$8 sps:$4 sm:$0xff] (!%p238_p12)   ;;  %v755_v7 = vld [vmem:[%s246_s15 + $0x14] ss:$8 sps:$4 sm:$0xff] (!%p238_p12)   ;;  %296 = vperm.xlu0 (!%p238_p12), %750, %v286_v9   ;;  %306 = vperm.xlu1 (!%p238_p12), %751, %v288_v10  }
  0x23   : > { %387 = vmatprep.subr.bf16.mxu0 (!%p238_p12), %v752_v5  ;;  %704 = vmatprep.subr.bf16.mxu1 (!%p238_p12), %v752_v5  ;;  %v757_v8 = vld [vmem:[%s246_s15 + $0x10] ss:$8 sps:$4 sm:$0xff] (!%p238_p12)   ;;  %v760_v17 = vld [vmem:[%s1017_s1 + $0x8] sm:$0xff] (!%p238_p12)   ;;  %s667_s10 = sshll.u32 (!%p238_p12), %s920_s13, 1  ;;  %s687_s11 = sshll.u32 (!%p238_p12), %s658_s4, 5 }
  0x24   : > { %388 = vmatpush1.bf16.msra.mxu0 (!%p238_p12), %v754_v6  ;;  %706 = vmatpush1.bf16.msra.mxu1 (!%p238_p12), %v754_v6  ;;  %v292_v19 = vld [vmem:[%s1018_s2 + $0x30] sm:$0xff] (!%p238_p12)  ;;  %v293_v20 = vld [vmem:[%s1018_s2 + $0x38] sm:$0xff] (!%p238_p12)  ;;  %s270_s12 = scalar_lea.vmem (!%p238_p12), [#allocation4], %s667_s10  ;;  %s972_s17 = scalar_lea.hbm (!%p238_p12), %s1021_s5, %s687_s11 }
  0x25   : > { %389 = vmatprep.subr.bf16.mxu0 (!%p238_p12), %v755_v7  ;;  %705 = vmatprep.subr.bf16.mxu1 (!%p238_p12), %v755_v7  ;;  %s594_s14 = sshll.u32 (!%p238_p12), %s270_s12, 4  ;;  %s580_s18 = scalar_lea.sflag (!%p238_p12), [#allocation5], %s920_s13  ;;  %s974_s14 = int_to_ptr.vmem [resolvable:$true] %s594_s14 }
  0x26   : > { %301 = vperm.xlu0 (!%p238_p12), %750, %v287_v13   ;;  %311 = vperm.xlu1 (!%p238_p12), %751, %v289_v14   ;;  %s762_s19 = scalar_lea.vmem (!%p238_p12), %s974_s14, 32  ;;  %s829_s4 = smov (!%p238_p12), [#allocation4]  }
  0x27   : > { %p763_p13 = scmp.ne.s32.totalorder %s974_s14, %s762_s19  ;;  %s766_s24 = sshll.u32 %s829_s4, 4  ;;  %s767_s24 = int_to_ptr.vmem [resolvable:$false] %s766_s24 }
  0x28   : > { %390 = vmatpush1.bf16.msra.mxu0 %v757_v8  ;;  %707 = vmatpush1.bf16.msra.mxu1 %v757_v8  ;;  %s768_s26 = scalar_lea.vmem %s767_s24, 64  ;;  %p769_p2 = scmp.lt.s32.totalorder %s974_s14, %s767_s24 }
  0x29   : > { %p764_p0 = pnand %p763_p13, %p901_p6  ;;  %p770_p3 = scmp.lt.s32.totalorder %s768_s26, %s762_s19 }
  0x2a   : > { %316 = vperm.xlu0 %750, %v290_v15   ;;  %321 = vperm.xlu1 %751, %v291_v16  }
  0x2b   : > { %676 = vmatmul.mubr.msk.bf16.vlgmr.msra.gmra.mrb[0].mxu0 %vm374_vm0, %v758_v11  ;;  %678 = vmatmul.mubr.msk.bf16.vlgmr.msra.gmra.mrb[0].mxu1 %vm374_vm0, %v759_v12  ;;  %p765_p1 = pneg %p764_p0  ;;  %p771_p4 = por %p770_p3, %p769_p2 }
  0x2c   : > { %429 = vmatprep.mubr.bf16.mxu0 %v826_v4  ;;  %449 = vmatprep.mubr.bf16.mxu1 %v826_v4 }
  0x2d   : > { %p772_p5 = pnand %p771_p4, %p765_p1 }
  0x2e   : > { %326 = vperm.xlu0 %750, %v292_v19   ;;  %331 = vperm.xlu1 %751, %v293_v20  }
  0x33   : > { %677 = vmatmul.mubr.msk.bf16.gmra.mrb[4].mxu0 %vm374_vm0, %v760_v17  ;;  %679 = vmatmul.mubr.msk.bf16.gmra.mrb[4].mxu1 %vm374_vm0, %v761_v18 }
  0x34   : > { %547 = vmatprep.mubr.f32.mxu1 %v827_v21 }
  0xa1   : > { %v297_v22 = vpop.permute.xlu0 %296  ;;  %v307_v23 = vpop.permute.xlu1 %306 }
  0xa5   : > { %v302_v24 = vpop.permute.xlu0 %301  ;;  %v312_v25 = vpop.permute.xlu1 %311 }
  0xa9   : > { %v317_v26 = vpop.permute.xlu0 %316  ;;  %v322_v27 = vpop.permute.xlu1 %321 }
  0xad   : > { %v327_v54 = vpop.permute.xlu0 %326  ;;  %v332_v55 = vpop.permute.xlu1 %331 }
  0xfe   : > { %v421_v28 = vpop.f32.mrb[0].mxu0  ;;  %v441_v29 = vpop.f32.mrb[0].mxu1 }
  0xff   : > { %v422_v30 = vadd.f32 %v421_v28, %v297_v22  ;;  %v442_v31 = vadd.f32 %v441_v29, %v317_v26  ;;  %v423_v32 = vpop.f32.mrb[1].mxu0  ;;  %v443_v33 = vpop.f32.mrb[1].mxu1 }
 0x100   : > { %v424_v34 = vadd.f32 %v423_v32, %v297_v22  ;;  %v444_v35 = vadd.f32 %v443_v33, %v317_v26  ;;  %v425_v36 = vpop.f32.mrb[2].mxu0  ;;  %v445_v37 = vpop.f32.mrb[2].mxu1  ;;  %v476_v22 = vld [vmem:[%s1019_s3] sm:$0x1]  ;;  %v478_v26 = vstv %s477_s9 }
 0x101   : > { %v468_v38 = vmax.f32 %v442_v31, 0.0  ;;  %v426_v39 = vadd.f32 %v425_v36, %v302_v24  ;;  %v446_v40 = vadd.f32 %v445_v37, %v322_v27  ;;  %v427_v41 = vpop.f32.mrb[3].mxu0  ;;  %v447_v42 = vpop.f32.mrb[3].mxu1  ;;  %v460_v46 = vmax.f32 %v422_v30, 0.0 }
 0x102   : > { %v469_v43 = vmax.f32 %v444_v35, 0.0  ;;  %v428_v44 = vadd.f32 %v427_v41, %v302_v24  ;;  %v448_v45 = vadd.f32 %v447_v42, %v322_v27  ;;  %v461_v49 = vmax.f32 %v424_v34, 0.0 }
 0x103   : > { %v462_v47 = vmax.f32 %v426_v39, 0.0  ;;  %v470_v48 = vmax.f32 %v446_v40, 0.0 }
 0x104   : > { %v463_v50 = vmax.f32 %v428_v44, 0.0  ;;  %v471_v51 = vmax.f32 %v448_v45, 0.0 }
 0x105   : > { %v690_v52 = vpack.c.bf16 %v462_v47, %v460_v46  ;;  %v698_v53 = vpack.c.bf16 %v470_v48, %v468_v38 }
 0x106   : > { %v688_v56 = vpack.c.bf16 %v463_v50, %v461_v49  ;;  %v696_v57 = vpack.c.bf16 %v471_v51, %v469_v43  ;;  %v431_v58 = vpop.f32.mrb[4].mxu0  ;;  %v451_v59 = vpop.f32.mrb[4].mxu1 }
 0x107   : > { %v432_v60 = vadd.f32 %v431_v58, %v307_v23  ;;  %v452_v61 = vadd.f32 %v451_v59, %v327_v54  ;;  %v433_v62 = vpop.f32.mrb[5].mxu0  ;;  %v453_v63 = vpop.f32.mrb[5].mxu1 }
 0x108   : > { %v434_v0 = vadd.f32 %v433_v62, %v307_v23  ;;  %v454_v1 = vadd.f32 %v453_v63, %v327_v54  ;;  %v435_v2 = vpop.f32.mrb[6].mxu0  ;;  %v455_v3 = vpop.f32.mrb[6].mxu1  ;;  %689 = vmatprep.subr.bf16.mxu1 %v688_v56  ;;  %v828_v23 = vmov 1966171168  }
 0x109   : > { %v436_v4 = vadd.f32 %v435_v2, %v312_v25  ;;  %v456_v5 = vadd.f32 %v455_v3, %v332_v55  ;;  %v437_v6 = vpop.f32.mrb[7].mxu0  ;;  %v457_v7 = vpop.f32.mrb[7].mxu1  ;;  %691 = vmatpush1.bf16.msra.mxu1 %v690_v52  ;;  %v464_v10 = vmax.f32 %v432_v60, 0.0  ;;  %v472_v11 = vmax.f32 %v452_v61, 0.0 }
 0x10a   : > { %v438_v8 = vadd.f32 %v437_v6, %v312_v25  ;;  %v458_v9 = vadd.f32 %v457_v7, %v332_v55  ;;  %v465_v14 = vmax.f32 %v434_v0, 0.0  ;;  %v473_v15 = vmax.f32 %v454_v1, 0.0 }
 0x10b   : > { %v466_v12 = vmax.f32 %v436_v4, 0.0  ;;  %v474_v13 = vmax.f32 %v456_v5, 0.0  ;;  %v560_v24 = vunpack.c.l.s4 %v828_v23  ;;  %v562_v25 = vlaneseq }
 0x10c   : > { %v467_v16 = vmax.f32 %v438_v8, 0.0  ;;  %v475_v17 = vmax.f32 %v458_v9, 0.0 }
 0x10d   : > { %v694_v18 = vpack.c.bf16 %v466_v12, %v464_v10  ;;  %v702_v19 = vpack.c.bf16 %v474_v13, %v472_v11  ;;  %v561_v28 = vunpack.c.0.s8 %v560_v24  ;;  %v563_v29 = vshrl.u32 %v562_v25, 7 }
 0x10e   : > { %v692_v20 = vpack.c.bf16 %v467_v16, %v465_v14  ;;  %v700_v21 = vpack.c.bf16 %v475_v17, %v473_v15  ;;  %vm576_vm2 = vcmp.lt.s32.totalorder %v562_v25, 256 }
 0x10f   : > { %v564_v35 = vsub.s32 %v561_v28, %v563_v29 }
 0x110   : > { %693 = vmatprep.subr.bf16.mxu1 %v692_v20 }
 0x111   : > { %695 = vmatpush1.bf16.msra.mxu1 %v694_v18 }
 0x112   : > { %697 = vmatprep.subr.bf16.mxu1 %v696_v57 }
 0x115   : > { %699 = vmatpush1.bf16.msra.mxu1 %v698_v53 }
 0x116   : > { %701 = vmatprep.subr.bf16.mxu1 %v700_v21 }
 0x119   : > { %703 = vmatpush1.bf16.msra.mxu1 %v702_v19 }
 0x11c   : > { %680 = vmatmul.mubr.msk.f32.vlgmr.msra.gmra.mrb[8].mxu1 %vm479_vm1, %v476_v22 }
 0x1ef   : > { %v549_v27 = vpop.f32.mrb[8].mxu1 }
 0x1f0   : > { %v550_v30 = vadd.f32 %v549_v27, %v478_v26  ;;  %v551_v31 = vpop.f32.mrb[9].mxu1 }
 0x1f1   : > { %v552_v32 = vadd.f32 %v551_v31, %v478_v26 }
 0x1f2   : > { %v554_v33 = vmax.f32 %v550_v30, 0.0 }
 0x1f3   : > { %v555_v34 = vmax.f32 %v552_v32, 0.0 }
 0x1f5   : > { %v558_v36 = vcombine.low %v554_v33, %v555_v34 }
 0x1f7   : > { %v565_v37 = vrot.slane %v558_v36, %v564_v35 }
 0x1f9   : > { %v572_v38 = vrot.slane %v565_v37, %v564_v35 }
 0x1fb   : > { %578 = vst.msk [vmem:[%s270_s12] sm:$0x3] %vm576_vm2, %v572_v38 }
 0x1fc   : > { %775 = shalt.err (!%p772_p5)
}
 0x1fd   : > { %s776_s13 = scalar_lea.hbm %s972_s17, 32  ;;  %s780_s7 = scalar_lea.hbm %s1021_s5, 64 }
 0x1fe   : > { %p777_p7 = scmp.ne.s32.totalorder %s972_s17, %s776_s13  ;;  %p781_p12 = scmp.lt.u32.totalorder %s972_s17, %s1021_s5 }
 0x1ff   : > { %p782_p13 = scmp.lt.u32.totalorder %s780_s7, %s776_s13  ;;  %p784_p1 = scmp.lt.u32.totalorder %s776_s13, %s972_s17 }
 0x200   : > { %p778_p10 = pnand %p777_p7, %p901_p6 }
 0x201   : > { %p783_p0 = por %p782_p13, %p781_p12 }
 0x202   : > { %p779_p11 = pneg %p778_p10 }
 0x203   : > { %p785_p2 = por %p784_p1, %p783_p0 }
 0x205   : > { %p786_p3 = pnand %p785_p2, %p779_p11 }
 0x207   : > { %789 = shalt.err (!%p786_p3)
}
 0x208   : > { %708 = dma.vmem_to_hbm [thread:$0]  (%p901_p6), %s974_s14, 32, %s972_s17, %s580_s18  }
 0x209 PF: > { %s606_s10 = sand.u32 1, %s812_s20   ;;  %p711_p4 = pnand %p661_p9, %p905_p8 }
 0x20a   : > { %s607_s11 = scalar_lea.sflag [#allocation5], %s606_s10 }
 0x20b   : > { %807 = dma.done.wait (!%p711_p4), %s607_s11, 32  }
 0x20c   : > { %809 = vsyncadd (!%p711_p4), %s607_s11, 4294967264  ;;  %p16_p5 = scmp.ge.s32.totalorder %s886_s25, 4   ;;  %s1024_s20 = smov %s816_s21 }
 0x20d   : > { %s1025_s21 = smov %s820_s22  ;;  %s1026_s22 = smov %s899_s28 }
 0x20e   : > { %s1027_s23 = smov %s886_s25  ;;  %18 = sbr.rel (!%p16_p5) target bundleno = 5 (0x5), region = 118 }
 0x215   :  { %612 = vsyncpa [#allocation5], 1 }
 0x216   :  { %614 = vsyncpa [#allocation5 + $0x1], 1 }

// kernel: tpu_custom_call.1
= control target key start
LH: loop header
LB: loop body
LE: loop exit
PB: predicated region body
PF: predicated region fallthrough
CT: control target
= control target key end

     0   :  { %s1016_s0 = inlined_call_operand.vmem [shape: bf16[32,512], index: 0, kind: input, shape index: {}]   ;;  %s1017_s1 = inlined_call_operand.vmem [shape: bf16[64,32], index: 1, kind: input, shape index: {}]   ;;  %s1018_s2 = inlined_call_operand.vmem [shape: f32[64,1], index: 2, kind: input, shape index: {}]   ;;  %s1019_s3 = inlined_call_operand.vmem [shape: f32[1,64], index: 3, kind: input, shape index: {}]   ;;  %s1020_s4 = inlined_call_operand.<no memory space> [shape: f32[1], index: 4, kind: input, shape index: {}]   ;;  %s1021_s5 = inlined_call_operand.hbm [shape: f32[1,512], index: 5, kind: output, shape index: {}]  }
   0x1   :  { %10 = sst [smem:[#allocation2]] %s1020_s4 }
   0x2   :  { %11 = vsyncpa [#allocation5], 0 }
   0x3   :  { %13 = vsyncpa [#allocation5 + $0x1], 0  ;;  %s863_s20 = smov 0   ;;  %s865_s21 = smov 0  }
   0x4   :  { %s867_s22 = smov 0   ;;  %s869_s23 = smov 0  }
   0x5 LB: > { %s658_s4 = sadd.s32 4294967295, %s824_s23   ;;  %s659_s24 = sadd.s32 4294967294, %s824_s23   ;;  %s824_s23 = sphi %s869_s23, %s1027_s23   ;;  %s820_s22 = sphi %s867_s22, %s1026_s22   ;;  %s816_s21 = sphi %s865_s21, %s1025_s21   ;;  %s812_s20 = sphi %s863_s20, %s1024_s20  }
   0x6   : > { %s886_s25 = sadd.s32 1, %s824_s23   ;;  %s26_s26 = sadd.s32 1, %s820_s22 }
   0x7   : > { %s23_s27 = ssub.s32 %s824_s23, %s886_s25  ;;  %p33_p0 = scmp.ne.s32.totalorder %s820_s22, %s816_s21 }
   0x8   : > { %p24_p1 = scmp.eq.s32.totalorder %s23_s27, 0  ;;  %p34_p2 = scmp.eq.s32.totalorder %s824_s23, 0 }
   0x9   : > { %p147_p3 = scmp.eq.s32.totalorder %s658_s4, 1  ;;  %p152_p4 = scmp.ne.s32.totalorder %s816_s21, %s812_s20 }
   0xa   : > { %s899_s28 = scalar_select %p24_p1, %s820_s22, %s26_s26  }
   0xb   : > { %p35_p5 = por %p34_p2, %p33_p0  ;;  %p901_p6 = por %p147_p3, %p33_p0 }
   0xc   : > { %p153_p7 = scmp.eq.s32.totalorder %s659_s24, 1  ;;  %p661_p9 = scmp.ge.s32.totalorder %s824_s23, 2 }
   0xe   : > { %p905_p8 = por %p153_p7, %p152_p4  ;;  %181 = sbr.rel (%p661_p9) target bundleno = 28 (0x1c), region = 32 }
  0x15   : > { %184 = sbr.rel (!%p35_p5) target bundleno = 28 (0x1c), region = 36  ;;  %s186_s6 = sand.u32 (%p35_p5), 1, %s820_s22  }
  0x16   : > { %s686_s7 = sshll.u32 (%p35_p5), %s824_s23, 3  ;;  %s662_s8 = sshll.u32 (%p35_p5), %s186_s6, 5 }
  0x17   : > { %s191_s11 = scalar_lea.vmem (%p35_p5), %s1016_s0, %s686_s7  ;;  %s188_s12 = scalar_lea.vmem (%p35_p5), [#allocation3], %s662_s8 }
  0x18   : > { %v225_v0 = vld [vmem:[%s191_s11] sm:$0xff] (%p35_p5)  ;;  %v227_v1 = vld [vmem:[%s191_s11 + $0x10] sm:$0xff] (%p35_p5) }
  0x19   : > { %v229_v2 = vld [vmem:[%s191_s11 + $0x20] sm:$0xff] (%p35_p5)  ;;  %226 = vst [vmem:[%s188_s12] sm:$0xff] (%p35_p5), %v225_v0  ;;  %228 = vst [vmem:[%s188_s12 + $0x8] sm:$0xff] (%p35_p5), %v227_v1  ;;  %v231_v3 = vld [vmem:[%s191_s11 + $0x30] sm:$0xff] (%p35_p5) }
  0x1a   : > { %230 = vst [vmem:[%s188_s12 + $0x10] sm:$0xff] (%p35_p5), %v229_v2  ;;  %232 = vst [vmem:[%s188_s12 + $0x18] sm:$0xff] (%p35_p5), %v231_v3 }
  0x1c PF: > { %p665_p10 = scmp.ge.s32.totalorder %s824_s23, 1  ;;  %p237_p11 = scmp.lt.s32.totalorder %s824_s23, 3 }
  0x1e   : > { %p238_p12 = pnand %p665_p10, %p237_p11 }
  0x1f   : > { %s920_s13 = sand.u32 (!%p238_p12), 1, %s816_s21   ;;  %v826_v4 = vmov (!%p238_p12), 0   ;;  %v286_v9 = vld [vmem:[%s1018_s2] sm:$0xff] (!%p238_p12)  ;;  %v288_v10 = vld [vmem:[%s1018_s2 + $0x10] sm:$0xff] (!%p238_p12)  ;;  %v287_v13 = vld [vmem:[%s1018_s2 + $0x8] sm:$0xff] (!%p238_p12)  ;;  %vm374_vm0 = vcmask (!%p238_p12), 261120  }
  0x20   : > { %241 = sbr.rel (%p238_p12) target bundleno = 521 (0x209), region = 74  ;;  %s666_s14 = sshll.u32 (!%p238_p12), %s920_s13, 5  ;;  %419 = vmatprep.mubr.bf16.mxu0 (!%p238_p12), %v826_v4  ;;  %439 = vmatprep.mubr.bf16.mxu1 (!%p238_p12), %v826_v4  ;;  %v758_v11 = vld [vmem:[%s1017_s1] sm:$0xff] (!%p238_p12)   ;;  %v759_v12 = vld [vmem:[%s1017_s1 + $0x10] sm:$0xff] (!%p238_p12)   ;;  %v289_v14 = vld [vmem:[%s1018_s2 + $0x18] sm:$0xff] (!%p238_p12)  ;;  %v827_v21 = vmov (!%p238_p12), 0.0  }
  0x21   : > { %750 = vset.pattern.permute.xlu0 (!%p238_p12), %v826_v4  ;;  %751 = vset.pattern.permute.xlu1 (!%p238_p12), %v826_v4  ;;  %s246_s15 = scalar_lea.vmem (!%p238_p12), [#allocation3], %s666_s14  ;;  %v290_v15 = vld [vmem:[%s1018_s2 + $0x20] sm:$0xff] (!%p238_p12)  ;;  %v291_v16 = vld [vmem:[%s1018_s2 + $0x28] sm:$0xff] (!%p238_p12)  ;;  %v761_v18 = vld [vmem:[%s1017_s1 + $0x18] sm:$0xff] (!%p238_p12)   ;;  %vm479_vm1 = vcmask (!%p238_p12), 523264   ;;  %s477_s9 = sld [smem:[#allocation2]] (!%p238_p12) }
  0x22   : > { %v752_v5 = vld [vmem:[%s246_s15 + $0x4] ss:$8 sps:$4 sm:$0xff] (!%p238_p12)   ;;  %v754_v6 = vld [vmem:[%s246_s15] ss:$8 sps:$4 sm:$0xff] (!%p238_p12)   ;;  %v755_v7 = vld [vmem:[%s246_s15 + $0x14] ss:$8 sps:$4 sm:$0xff] (!%p238_p12)   ;;  %296 = vperm.xlu0 (!%p238_p12), %750, %v286_v9   ;;  %306 = vperm.xlu1 (!%p238_p12), %751, %v288_v10  }
  0x23   : > { %387 = vmatprep.subr.bf16.mxu0 (!%p238_p12), %v752_v5  ;;  %704 = vmatprep.subr.bf16.mxu1 (!%p238_p12), %v752_v5  ;;  %v757_v8 = vld [vmem:[%s246_s15 + $0x10] ss:$8 sps:$4 sm:$0xff] (!%p238_p12)   ;;  %v760_v17 = vld [vmem:[%s1017_s1 + $0x8] sm:$0xff] (!%p238_p12)   ;;  %s667_s10 = sshll.u32 (!%p238_p12), %s920_s13, 1  ;;  %s687_s11 = sshll.u32 (!%p238_p12), %s658_s4, 5 }
  0x24   : > { %388 = vmatpush1.bf16.msra.mxu0 (!%p238_p12), %v754_v6  ;;  %706 = vmatpush1.bf16.msra.mxu1 (!%p238_p12), %v754_v6  ;;  %v292_v19 = vld [vmem:[%s1018_s2 + $0x30] sm:$0xff] (!%p238_p12)  ;;  %v293_v20 = vld [vmem:[%s1018_s2 + $0x38] sm:$0xff] (!%p238_p12)  ;;  %s270_s12 = scalar_lea.vmem (!%p238_p12), [#allocation4], %s667_s10  ;;  %s972_s17 = scalar_lea.hbm (!%p238_p12), %s1021_s5, %s687_s11 }
  0x25   : > { %389 = vmatprep.subr.bf16.mxu0 (!%p238_p12), %v755_v7  ;;  %705 = vmatprep.subr.bf16.mxu1 (!%p238_p12), %v755_v7  ;;  %s594_s14 = sshll.u32 (!%p238_p12), %s270_s12, 4  ;;  %s580_s18 = scalar_lea.sflag (!%p238_p12), [#allocation5], %s920_s13  ;;  %s974_s14 = int_to_ptr.vmem [resolvable:$true] %s594_s14 }
  0x26   : > { %301 = vperm.xlu0 (!%p238_p12), %750, %v287_v13   ;;  %311 = vperm.xlu1 (!%p238_p12), %751, %v289_v14   ;;  %s762_s19 = scalar_lea.vmem (!%p238_p12), %s974_s14, 32  ;;  %s829_s4 = smov (!%p238_p12), [#allocation4]  }
  0x27   : > { %p763_p13 = scmp.ne.s32.totalorder %s974_s14, %s762_s19  ;;  %s766_s24 = sshll.u32 %s829_s4, 4  ;;  %s767_s24 = int_to_ptr.vmem [resolvable:$false] %s766_s24 }
  0x28   : > { %390 = vmatpush1.bf16.msra.mxu0 %v757_v8  ;;  %707 = vmatpush1.bf16.msra.mxu1 %v757_v8  ;;  %s768_s26 = scalar_lea.vmem %s767_s24, 64  ;;  %p769_p2 = scmp.lt.s32.totalorder %s974_s14, %s767_s24 }
  0x29   : > { %p764_p0 = pnand %p763_p13, %p901_p6  ;;  %p770_p3 = scmp.lt.s32.totalorder %s768_s26, %s762_s19 }
  0x2a   : > { %316 = vperm.xlu0 %750, %v290_v15   ;;  %321 = vperm.xlu1 %751, %v291_v16  }
  0x2b   : > { %676 = vmatmul.mubr.msk.bf16.vlgmr.msra.gmra.mrb[0].mxu0 %vm374_vm0, %v758_v11  ;;  %678 = vmatmul.mubr.msk.bf16.vlgmr.msra.gmra.mrb[0].mxu1 %vm374_vm0, %v759_v12  ;;  %p765_p1 = pneg %p764_p0  ;;  %p771_p4 = por %p770_p3, %p769_p2 }
  0x2c   : > { %429 = vmatprep.mubr.bf16.mxu0 %v826_v4  ;;  %449 = vmatprep.mubr.bf16.mxu1 %v826_v4 }
  0x2d   : > { %p772_p5 = pnand %p771_p4, %p765_p1 }
  0x2e   : > { %326 = vperm.xlu0 %750, %v292_v19   ;;  %331 = vperm.xlu1 %751, %v293_v20  }
  0x33   : > { %677 = vmatmul.mubr.msk.bf16.gmra.mrb[4].mxu0 %vm374_vm0, %v760_v17  ;;  %679 = vmatmul.mubr.msk.bf16.gmra.mrb[4].mxu1 %vm374_vm0, %v761_v18 }
  0x34   : > { %547 = vmatprep.mubr.f32.mxu1 %v827_v21 }
  0xa1   : > { %v297_v22 = vpop.permute.xlu0 %296  ;;  %v307_v23 = vpop.permute.xlu1 %306 }
  0xa5   : > { %v302_v24 = vpop.permute.xlu0 %301  ;;  %v312_v25 = vpop.permute.xlu1 %311 }
  0xa9   : > { %v317_v26 = vpop.permute.xlu0 %316  ;;  %v322_v27 = vpop.permute.xlu1 %321 }
  0xad   : > { %v327_v54 = vpop.permute.xlu0 %326  ;;  %v332_v55 = vpop.permute.xlu1 %331 }
  0xfe   : > { %v421_v28 = vpop.f32.mrb[0].mxu0  ;;  %v441_v29 = vpop.f32.mrb[0].mxu1 }
  0xff   : > { %v422_v30 = vadd.f32 %v421_v28, %v297_v22  ;;  %v442_v31 = vadd.f32 %v441_v29, %v317_v26  ;;  %v423_v32 = vpop.f32.mrb[1].mxu0  ;;  %v443_v33 = vpop.f32.mrb[1].mxu1 }
 0x100   : > { %v424_v34 = vadd.f32 %v423_v32, %v297_v22  ;;  %v444_v35 = vadd.f32 %v443_v33, %v317_v26  ;;  %v425_v36 = vpop.f32.mrb[2].mxu0  ;;  %v445_v37 = vpop.f32.mrb[2].mxu1  ;;  %v476_v22 = vld [vmem:[%s1019_s3] sm:$0x1]  ;;  %v478_v26 = vstv %s477_s9 }
 0x101   : > { %v468_v38 = vmax.f32 %v442_v31, 0.0  ;;  %v426_v39 = vadd.f32 %v425_v36, %v302_v24  ;;  %v446_v40 = vadd.f32 %v445_v37, %v322_v27  ;;  %v427_v41 = vpop.f32.mrb[3].mxu0  ;;  %v447_v42 = vpop.f32.mrb[3].mxu1  ;;  %v460_v46 = vmax.f32 %v422_v30, 0.0 }
 0x102   : > { %v469_v43 = vmax.f32 %v444_v35, 0.0  ;;  %v428_v44 = vadd.f32 %v427_v41, %v302_v24  ;;  %v448_v45 = vadd.f32 %v447_v42, %v322_v27  ;;  %v461_v49 = vmax.f32 %v424_v34, 0.0 }
 0x103   : > { %v462_v47 = vmax.f32 %v426_v39, 0.0  ;;  %v470_v48 = vmax.f32 %v446_v40, 0.0 }
 0x104   : > { %v463_v50 = vmax.f32 %v428_v44, 0.0  ;;  %v471_v51 = vmax.f32 %v448_v45, 0.0 }
 0x105   : > { %v690_v52 = vpack.c.bf16 %v462_v47, %v460_v46  ;;  %v698_v53 = vpack.c.bf16 %v470_v48, %v468_v38 }
 0x106   : > { %v688_v56 = vpack.c.bf16 %v463_v50, %v461_v49  ;;  %v696_v57 = vpack.c.bf16 %v471_v51, %v469_v43  ;;  %v431_v58 = vpop.f32.mrb[4].mxu0  ;;  %v451_v59 = vpop.f32.mrb[4].mxu1 }
 0x107   : > { %v432_v60 = vadd.f32 %v431_v58, %v307_v23  ;;  %v452_v61 = vadd.f32 %v451_v59, %v327_v54  ;;  %v433_v62 = vpop.f32.mrb[5].mxu0  ;;  %v453_v63 = vpop.f32.mrb[5].mxu1 }
 0x108   : > { %v434_v0 = vadd.f32 %v433_v62, %v307_v23  ;;  %v454_v1 = vadd.f32 %v453_v63, %v327_v54  ;;  %v435_v2 = vpop.f32.mrb[6].mxu0  ;;  %v455_v3 = vpop.f32.mrb[6].mxu1  ;;  %689 = vmatprep.subr.bf16.mxu1 %v688_v56  ;;  %v828_v23 = vmov 1966171168  }
 0x109   : > { %v436_v4 = vadd.f32 %v435_v2, %v312_v25  ;;  %v456_v5 = vadd.f32 %v455_v3, %v332_v55  ;;  %v437_v6 = vpop.f32.mrb[7].mxu0  ;;  %v457_v7 = vpop.f32.mrb[7].mxu1  ;;  %691 = vmatpush1.bf16.msra.mxu1 %v690_v52  ;;  %v464_v10 = vmax.f32 %v432_v60, 0.0  ;;  %v472_v11 = vmax.f32 %v452_v61, 0.0 }
 0x10a   : > { %v438_v8 = vadd.f32 %v437_v6, %v312_v25  ;;  %v458_v9 = vadd.f32 %v457_v7, %v332_v55  ;;  %v465_v14 = vmax.f32 %v434_v0, 0.0  ;;  %v473_v15 = vmax.f32 %v454_v1, 0.0 }
 0x10b   : > { %v466_v12 = vmax.f32 %v436_v4, 0.0  ;;  %v474_v13 = vmax.f32 %v456_v5, 0.0  ;;  %v560_v24 = vunpack.c.l.s4 %v828_v23  ;;  %v562_v25 = vlaneseq }
 0x10c   : > { %v467_v16 = vmax.f32 %v438_v8, 0.0  ;;  %v475_v17 = vmax.f32 %v458_v9, 0.0 }
 0x10d   : > { %v694_v18 = vpack.c.bf16 %v466_v12, %v464_v10  ;;  %v702_v19 = vpack.c.bf16 %v474_v13, %v472_v11  ;;  %v561_v28 = vunpack.c.0.s8 %v560_v24  ;;  %v563_v29 = vshrl.u32 %v562_v25, 7 }
 0x10e   : > { %v692_v20 = vpack.c.bf16 %v467_v16, %v465_v14  ;;  %v700_v21 = vpack.c.bf16 %v475_v17, %v473_v15  ;;  %vm576_vm2 = vcmp.lt.s32.totalorder %v562_v25, 256 }
 0x10f   : > { %v564_v35 = vsub.s32 %v561_v28, %v563_v29 }
 0x110   : > { %693 = vmatprep.subr.bf16.mxu1 %v692_v20 }
 0x111   : > { %695 = vmatpush1.bf16.msra.mxu1 %v694_v18 }
 0x112   : > { %697 = vmatprep.subr.bf16.mxu1 %v696_v57 }
 0x115   : > { %699 = vmatpush1.bf16.msra.mxu1 %v698_v53 }
 0x116   : > { %701 = vmatprep.subr.bf16.mxu1 %v700_v21 }
 0x119   : > { %703 = vmatpush1.bf16.msra.mxu1 %v702_v19 }
 0x11c   : > { %680 = vmatmul.mubr.msk.f32.vlgmr.msra.gmra.mrb[8].mxu1 %vm479_vm1, %v476_v22 }
 0x1ef   : > { %v549_v27 = vpop.f32.mrb[8].mxu1 }
 0x1f0   : > { %v550_v30 = vadd.f32 %v549_v27, %v478_v26  ;;  %v551_v31 = vpop.f32.mrb[9].mxu1 }
 0x1f1   : > { %v552_v32 = vadd.f32 %v551_v31, %v478_v26 }
 0x1f2   : > { %v554_v33 = vmax.f32 %v550_v30, 0.0 }
 0x1f3   : > { %v555_v34 = vmax.f32 %v552_v32, 0.0 }
 0x1f5   : > { %v558_v36 = vcombine.low %v554_v33, %v555_v34 }
 0x1f7   : > { %v565_v37 = vrot.slane %v558_v36, %v564_v35 }
 0x1f9   : > { %v572_v38 = vrot.slane %v565_v37, %v564_v35 }
 0x1fb   : > { %578 = vst.msk [vmem:[%s270_s12] sm:$0x3] %vm576_vm2, %v572_v38 }
 0x1fc   : > { %775 = shalt.err (!%p772_p5)
}
 0x1fd   : > { %s776_s13 = scalar_lea.hbm %s972_s17, 32  ;;  %s780_s7 = scalar_lea.hbm %s1021_s5, 64 }
 0x1fe   : > { %p777_p7 = scmp.ne.s32.totalorder %s972_s17, %s776_s13  ;;  %p781_p12 = scmp.lt.u32.totalorder %s972_s17, %s1021_s5 }
 0x1ff   : > { %p782_p13 = scmp.lt.u32.totalorder %s780_s7, %s776_s13  ;;  %p784_p1 = scmp.lt.u32.totalorder %s776_s13, %s972_s17 }
 0x200   : > { %p778_p10 = pnand %p777_p7, %p901_p6 }
 0x201   : > { %p783_p0 = por %p782_p13, %p781_p12 }
 0x202   : > { %p779_p11 = pneg %p778_p10 }
 0x203   : > { %p785_p2 = por %p784_p1, %p783_p0 }
 0x205   : > { %p786_p3 = pnand %p785_p2, %p779_p11 }
 0x207   : > { %789 = shalt.err (!%p786_p3)
}
 0x208   : > { %708 = dma.vmem_to_hbm [thread:$0]  (%p901_p6), %s974_s14, 32, %s972_s17, %s580_s18  }
 0x209 PF: > { %s606_s10 = sand.u32 1, %s812_s20   ;;  %p711_p4 = pnand %p661_p9, %p905_p8 }
 0x20a   : > { %s607_s11 = scalar_lea.sflag [#allocation5], %s606_s10 }
 0x20b   : > { %807 = dma.done.wait (!%p711_p4), %s607_s11, 32  }
 0x20c   : > { %809 = vsyncadd (!%p711_p4), %s607_s11, 4294967264  ;;  %p16_p5 = scmp.ge.s32.totalorder %s886_s25, 4   ;;  %s1024_s20 = smov %s816_s21 }
 0x20d   : > { %s1025_s21 = smov %s820_s22  ;;  %s1026_s22 = smov %s899_s28 }
 0x20e   : > { %s1027_s23 = smov %s886_s25  ;;  %18 = sbr.rel (!%p16_p5) target bundleno = 5 (0x5), region = 118 }
 0x215   :  { %612 = vsyncpa [#allocation5], 1 }
 0x216   :  { %614 = vsyncpa [#allocation5 + $0x1], 1 }

</bundles_post_ra>
